<compile_context>
chip_gen: v7x
topology: tpu7x:2x2x1
jax: 0.10.0
libtpu: 0.0.40
codegen_flags: <defaults>
</compile_context>

<pallas_src>
import jax
import jax.numpy as jnp
from jax.experimental import pallas as pl
from jax.experimental.pallas import tpu as pltpu

inFeatures = 2
outFeatures = 1


def net_kernel(x_ref, p_ref, o_ref):
    # x_ref: (1, 2) f32  -- row 0 of X (only row that feeds the output)
    # p_ref: (8, 2) f32  -- packed params:
    #   row 0: W1[:, 0]      row 1: W1[:, 1]      row 2: b1
    #   row 3: W2[:, 0]      row 4: W2[:, 1]      row 5: b2
    #   row 6: W3[0, :]      row 7: [b3[0], 0.5*N]
    x = x_ref[...]                                   # (1, 2)
    p = p_ref[...]                                   # (8, 2)

    w1c0, w1c1, b1 = p[0:1, :], p[1:2, :], p[2:3, :]
    w2c0, w2c1, b2 = p[3:4, :], p[4:5, :], p[5:6, :]
    w3row = p[6:7, :]
    b3 = p[7:8, 0:1]
    half_n = p[7:8, 1:2]                             # 0.5 * N

    # syn1 + neuro1 on the single surviving row (VPU multiply-adds, no MXU).
    h1 = jax.nn.sigmoid(x[:, 0:1] * w1c0 + x[:, 1:2] * w1c1 + b1)     # (1, 2)

    # fanIn (Adder), row 0 only: a0 = N * avg(h1[0]) = 0.5*N*(h1_00 + h1_01).
    a0 = half_n * (h1[:, 0:1] + h1[:, 1:2])                           # (1, 1)

    # fanOut (Propo, outFeatures=2): v = [a0, a0]  ->  both lanes equal a0.
    # syn2 + neuro2:
    h2 = jax.nn.sigmoid(a0 * w2c0 + a0 * w2c1 + b2)                   # (1, 2)

    # syn3 + neuro3:
    z3 = h2 * w3row                                                   # (1, 2)
    o_ref[...] = jax.nn.sigmoid(z3[:, 0:1] + z3[:, 1:2] + b3)         # (1, 1)


def pack_params(params, n):
    """Pack all Linear params + the Adder scale (0.5*N) into one (8, 2) f32 array."""
    w1, b1, w2, b2, w3, b3 = params
    row7 = jnp.stack([b3[0], jnp.float32(0.5 * n)])
    p = jnp.stack([
        w1[:, 0], w1[:, 1], b1,      # syn1
        w2[:, 0], w2[:, 1], b2,      # syn2
        w3[0, :], row7,              # syn3 (+ b3, 0.5*N)
    ])
    return p.astype(jnp.float32)


def net_forward(x, params):
    n = x.shape[0]
    x0 = x[:1].astype(jnp.float32)                   # (1, 2): only row 0 matters
    p = pack_params(params, n)                       # (8, 2): single param DMA
    vmem = pl.BlockSpec(memory_space=pltpu.MemorySpace.VMEM)
    out = pl.pallas_call(
        net_kernel,
        out_shape=jax.ShapeDtypeStruct((1, 1), jnp.float32),
        in_specs=[vmem, vmem],
        out_specs=vmem,
    )(x0, p)
    return out.reshape(outFeatures)                  # (1,), matches PyTorch output


def init_params(key):
    """Deterministic init mimicking nn.Linear's U(-1/sqrt(fan_in), 1/sqrt(fan_in))."""
    def linear(k, in_f, out_f):
        kw, kb = jax.random.split(k)
        bound = 1.0 / (in_f ** 0.5)
        w = jax.random.uniform(kw, (out_f, in_f), jnp.float32, -bound, bound)
        b = jax.random.uniform(kb, (out_f,), jnp.float32, -bound, bound)
        return w, b

    k1, k2, k3 = jax.random.split(key, 3)
    w1, b1 = linear(k1, inFeatures, inFeatures)
    w2, b2 = linear(k2, inFeatures, inFeatures)
    w3, b3 = linear(k3, inFeatures, outFeatures)
    return (w1, b1, w2, b2, w3, b3)


def net_reference(x, params):
    """Pure-JAX reference of the PyTorch forward (for sanity checking)."""
    w1, b1, w2, b2, w3, b3 = params
    h1 = jax.nn.sigmoid(x @ w1.T + b1)                       # (N, 2)
    a = x.shape[0] * jnp.mean(h1, axis=1, keepdims=True)     # (N, 1) Adder
    v = jnp.concatenate([a[0], a[0]])                        # (2,)   Propo
    h2 = jax.nn.sigmoid(v @ w2.T + b2)                       # (2,)
    return jax.nn.sigmoid(h2 @ w3.T + b3)                    # (1,)


if __name__ == "__main__":
    key = jax.random.PRNGKey(0)
    kx, kp = jax.random.split(key)

    N = 8                                   # batch of samples, each with inFeatures=2
    x = jax.random.normal(kx, (N, inFeatures), jnp.float32)
    params = init_params(kp)

    y = net_forward(x, params)
    jax.block_until_ready(y)

    y_ref = net_reference(x, params)
    assert y.shape == (outFeatures,)
    assert jnp.allclose(y, y_ref, atol=1e-5, rtol=1e-5), (y, y_ref)

    print("KERNEL_OK")
</pallas_src>

<mosaic_0001>
module attributes {stable_mosaic.version = 11 : i64} {
  func.func @net_kernel(%arg0: memref<1x2xf32, #tpu.memory_space<vmem>>, %arg1: memref<8x2xf32, #tpu.memory_space<vmem>>, %arg2: memref<1x1xf32, #tpu.memory_space<vmem>>) attributes {dimension_semantics = [], scalar_prefetch = 0 : i64, scratch_operands = 0 : i64, tpu.core_type = #tpu.core_type<tc>} {
    %c0 = arith.constant 0 : index
    %c0_0 = arith.constant 0 : index
    %0 = vector.load %arg0[%c0, %c0_0] : memref<1x2xf32, #tpu.memory_space<vmem>>, vector<1x2xf32>
    %c0_1 = arith.constant 0 : index
    %c0_2 = arith.constant 0 : index
    %1 = vector.load %arg1[%c0_1, %c0_2] : memref<8x2xf32, #tpu.memory_space<vmem>>, vector<8x2xf32>
    %2 = vector.extract_strided_slice %1 {offsets = [0, 0], sizes = [1, 2], strides = [1, 1]} : vector<8x2xf32> to vector<1x2xf32>
    %3 = vector.extract_strided_slice %1 {offsets = [1, 0], sizes = [1, 2], strides = [1, 1]} : vector<8x2xf32> to vector<1x2xf32>
    %4 = vector.extract_strided_slice %1 {offsets = [2, 0], sizes = [1, 2], strides = [1, 1]} : vector<8x2xf32> to vector<1x2xf32>
    %5 = vector.extract_strided_slice %1 {offsets = [3, 0], sizes = [1, 2], strides = [1, 1]} : vector<8x2xf32> to vector<1x2xf32>
    %6 = vector.extract_strided_slice %1 {offsets = [4, 0], sizes = [1, 2], strides = [1, 1]} : vector<8x2xf32> to vector<1x2xf32>
    %7 = vector.extract_strided_slice %1 {offsets = [5, 0], sizes = [1, 2], strides = [1, 1]} : vector<8x2xf32> to vector<1x2xf32>
    %8 = vector.extract_strided_slice %1 {offsets = [6, 0], sizes = [1, 2], strides = [1, 1]} : vector<8x2xf32> to vector<1x2xf32>
    %9 = vector.extract_strided_slice %1 {offsets = [7, 0], sizes = [1, 1], strides = [1, 1]} : vector<8x2xf32> to vector<1x1xf32>
    %10 = vector.extract_strided_slice %1 {offsets = [7, 1], sizes = [1, 1], strides = [1, 1]} : vector<8x2xf32> to vector<1x1xf32>
    %11 = vector.extract_strided_slice %0 {offsets = [0, 0], sizes = [1, 1], strides = [1, 1]} : vector<1x2xf32> to vector<1x1xf32>
    %12 = vector.broadcast %11 : vector<1x1xf32> to vector<1x2xf32>
    %13 = arith.mulf %12, %2 : vector<1x2xf32>
    %14 = vector.extract_strided_slice %0 {offsets = [0, 1], sizes = [1, 1], strides = [1, 1]} : vector<1x2xf32> to vector<1x1xf32>
    %15 = vector.broadcast %14 : vector<1x1xf32> to vector<1x2xf32>
    %16 = arith.mulf %15, %3 : vector<1x2xf32>
    %17 = arith.addf %13, %16 : vector<1x2xf32>
    %18 = arith.addf %17, %4 : vector<1x2xf32>
    %19 = arith.negf %18 : vector<1x2xf32>
    %20 = math.exp %19 : vector<1x2xf32>
    %cst = arith.constant 1.000000e+00 : f32
    %21 = vector.broadcast %cst : f32 to vector<1x2xf32>
    %22 = arith.addf %21, %20 : vector<1x2xf32>
    %23 = arith.divf %21, %22 : vector<1x2xf32>
    %24 = vector.extract_strided_slice %23 {offsets = [0, 0], sizes = [1, 1], strides = [1, 1]} : vector<1x2xf32> to vector<1x1xf32>
    %25 = vector.extract_strided_slice %23 {offsets = [0, 1], sizes = [1, 1], strides = [1, 1]} : vector<1x2xf32> to vector<1x1xf32>
    %26 = arith.addf %24, %25 : vector<1x1xf32>
    %27 = arith.mulf %10, %26 : vector<1x1xf32>
    %28 = vector.broadcast %27 : vector<1x1xf32> to vector<1x2xf32>
    %29 = arith.mulf %28, %5 : vector<1x2xf32>
    %30 = vector.broadcast %27 : vector<1x1xf32> to vector<1x2xf32>
    %31 = arith.mulf %30, %6 : vector<1x2xf32>
    %32 = arith.addf %29, %31 : vector<1x2xf32>
    %33 = arith.addf %32, %7 : vector<1x2xf32>
    %34 = arith.negf %33 : vector<1x2xf32>
    %35 = math.exp %34 : vector<1x2xf32>
    %cst_3 = arith.constant 1.000000e+00 : f32
    %36 = vector.broadcast %cst_3 : f32 to vector<1x2xf32>
    %37 = arith.addf %36, %35 : vector<1x2xf32>
    %38 = arith.divf %36, %37 : vector<1x2xf32>
    %39 = arith.mulf %38, %8 : vector<1x2xf32>
    %40 = vector.extract_strided_slice %39 {offsets = [0, 0], sizes = [1, 1], strides = [1, 1]} : vector<1x2xf32> to vector<1x1xf32>
    %41 = vector.extract_strided_slice %39 {offsets = [0, 1], sizes = [1, 1], strides = [1, 1]} : vector<1x2xf32> to vector<1x1xf32>
    %42 = arith.addf %40, %41 : vector<1x1xf32>
    %43 = arith.addf %42, %9 : vector<1x1xf32>
    %44 = arith.negf %43 : vector<1x1xf32>
    %45 = math.exp %44 : vector<1x1xf32>
    %cst_4 = arith.constant 1.000000e+00 : f32
    %46 = vector.broadcast %cst_4 : f32 to vector<1x1xf32>
    %47 = arith.addf %46, %45 : vector<1x1xf32>
    %48 = arith.divf %46, %47 : vector<1x1xf32>
    %c0_5 = arith.constant 0 : index
    %c0_6 = arith.constant 0 : index
    %49 = vector.load %arg2[%c0_5, %c0_6] : memref<1x1xf32, #tpu.memory_space<vmem>>, vector<1x1xf32>
    tpu.vector_store %arg2[%c0_5, %c0_6], %48 {strides = array<i32>} : memref<1x1xf32, #tpu.memory_space<vmem>>, vector<1x1xf32>,
    return
  }
}

</mosaic_0001>

<bundles_post_ra>
// kernel: tpu_custom_call.1
= control target key start
LH: loop header
LB: loop body
LE: loop exit
PB: predicated region body
PF: predicated region fallthrough
CT: control target
= control target key end

     0   :  { %v158_v1 = vmov 1   ;;  %s196_s0 = inlined_call_operand.vmem [shape: f32[1,2], index: 0, kind: input, shape index: {}]   ;;  %s197_s1 = inlined_call_operand.vmem [shape: f32[8,2], index: 1, kind: input, shape index: {}]   ;;  %s198_s2 = inlined_call_operand.hbm [shape: f32[1,1], index: 2, kind: output, shape index: {}]  }
   0x1   :  { %v12_v0 = vld [vmem:[%s196_s0] sm:$0x1]  ;;  %118 = vset.pattern.permute.xlu0 %v158_v1  ;;  %120 = vset.pattern.permute.xlu1 %v158_v1 }
   0x2   :  { %7 = vsyncpa [#allocation3], 0  ;;  %25 = vperm.xlu0 %118, %v12_v0   ;;  %v159_v2 = vmov 0   ;;  %v19_v3 = vlaneseq  ;;  %v13_v7 = vld [vmem:[%s197_s1] sm:$0xff]  ;;  %s160_s0 = smov 127   ;;  %s161_s1 = smov 1  }
   0x3   :  { %v38_v13 = vrot.slane %v13_v7, 2  ;;  %v63_v26 = vrot.slane %v13_v7, 4  ;;  %v66_v27 = vrot.slane %v13_v7, 5  ;;  %v70_v29 = vrot.slane %v13_v7, 6  ;;  %s162_s13 = smov [#allocation2]  }
   0x4   :  { %v20_v4 = vshrl.u32 %v19_v3, 7  ;;  %v79_v37 = vrot.slane %v13_v7, 7  ;;  %s102_s14 = sshll.u32 %s162_s13, 4  ;;  %vm94_vm0 = vcmask 7175   ;;  %s103_s14 = int_to_ptr.vmem [resolvable:$true] %s102_s14 }
   0x5   :  { %s134_s15 = scalar_lea.vmem %s103_s14, 16  ;;  %s138_s16 = scalar_lea.vmem %s103_s14, 32 }
   0x6   :  { %119 = vset.pattern.permute.xlu0 %v159_v2  ;;  %v21_v5 = vsub.s32 0, %v20_v4  ;;  %p135_p0 = scmp.ne.s32.totalorder %s103_s14, %s134_s15  ;;  %p139_p1 = scmp.lt.s32.totalorder %s103_s14, %s103_s14 }
   0x7   :  { %16 = vperm.xlu0 %119, %v12_v0   ;;  %p140_p2 = scmp.lt.s32.totalorder %s138_s16, %s134_s15 }
   0x9   :  { %p141_p3 = por %p140_p2, %p139_p1 }
   0xb   :  { %121 = vset.pattern.permute.xlu0 %v158_v1  ;;  %p142_p4 = pnand %p141_p3, %p135_p0 }
  0x81   :  { %v26_v6 = vpop.permute.xlu0 %25 }
  0x82   :  { %v31_v8 = vrot.slane %v26_v6, %v21_v5 }
  0x84   :  { %v32_v9 = vmul.f32 %v31_v8, %v13_v7 }
  0x86   :  { %v17_v10 = vpop.permute.xlu0 %16  ;;  %v34_v12 = vrot.slane %v32_v9, 1 }
  0x87   :  { %v22_v11 = vrot.slane %v17_v10, %v21_v5 }
  0x89   :  { %v23_v14 = vmul.f32 %v22_v11, %v13_v7 }
  0x8b   :  { %v36_v15 = vadd.f32 %v34_v12, %v23_v14 }
  0x8d   :  { %v40_v16 = vadd.f32 %v38_v13, %v36_v15 }
  0x8f   :  { %v110_v17 = vmul.f32 -1.442695, %v40_v16 }
  0x91   :  { %122 = vpow2.f32 %v110_v17 }
  0x9b   :  { %v123_v18 = vpop.eup %122 }
  0x9c   :  { %v44_v19 = vadd.f32 1.0, %v123_v18 }
  0x9e   :  { %124 = vrcp.f32 %v44_v19 }
  0xa8   :  { %v125_v20 = vpop.eup %124 }
  0xa9   :  { %48 = vrot.lane.b32.xlu1 %v125_v20, %s160_s0 }
 0x11b   :  { %v49_v21 = vpop.permute.xlu1 %48 }
 0x11c   :  { %v51_v22 = vadd.f32 %v125_v20, %v49_v21 }
 0x11e   :  { %v53_v23 = vrot.slane %v51_v22, 1 }
 0x120   :  { %54 = vrot.lane.b32.xlu1 %v53_v23, %s161_s1 }
 0x192   :  { %v55_v24 = vpop.permute.xlu1 %54 }
 0x193   :  { %v57_v25 = vmul.f32 %v55_v24, %v13_v7 }
 0x195   :  { %60 = vperm.xlu1 %120, %v57_v25  }
 0x214   :  { %v61_v28 = vpop.permute.xlu1 %60 }
 0x215   :  { %v65_v30 = vmul.f32 %v63_v26, %v61_v28  ;;  %v68_v31 = vmul.f32 %v66_v27, %v61_v28 }
 0x217   :  { %v69_v32 = vadd.f32 %v68_v31, %v65_v30 }
 0x219   :  { %v72_v33 = vadd.f32 %v70_v29, %v69_v32 }
 0x21b   :  { %v111_v34 = vmul.f32 -1.442695, %v72_v33 }
 0x21d   :  { %126 = vpow2.f32 %v111_v34 }
 0x227   :  { %v127_v35 = vpop.eup %126 }
 0x228   :  { %v76_v36 = vadd.f32 1.0, %v127_v35 }
 0x22a   :  { %128 = vrcp.f32 %v76_v36 }
 0x234   :  { %v129_v38 = vpop.eup %128 }
 0x235   :  { %v81_v39 = vmul.f32 %v129_v38, %v79_v37 }
 0x237   :  { %83 = vrot.lane.b32.xlu0 %v81_v39, %s160_s0 }
 0x2a9   :  { %v84_v40 = vpop.permute.xlu0 %83 }
 0x2aa   :  { %v86_v41 = vadd.f32 %v84_v40, %v81_v39 }
 0x2ac   :  { %v87_v42 = vadd.f32 %v86_v41, %v13_v7 }
 0x2ae   :  { %v112_v43 = vmul.f32 -1.442695, %v87_v42 }
 0x2b0   :  { %130 = vpow2.f32 %v112_v43 }
 0x2ba   :  { %v131_v44 = vpop.eup %130 }
 0x2bb   :  { %v91_v45 = vadd.f32 1.0, %v131_v44 }
 0x2bd   :  { %132 = vrcp.f32 %v91_v45 }
 0x2c7   :  { %v133_v46 = vpop.eup %132 }
 0x2c8   :  { %95 = vst.msk [vmem:[#allocation2 - $0x7] sm:$0x80] %vm94_vm0, %v133_v46 }
 0x2c9   :  { %145 = shalt.err (!%p142_p4)
}
 0x2ca   :  { %s146_s19 = scalar_lea.hbm %s198_s2, 16 }
 0x2cb   :  { %p147_p5 = scmp.ne.s32.totalorder %s198_s2, %s146_s19  ;;  %p150_p6 = scmp.lt.u32.totalorder %s146_s19, %s198_s2 }
 0x2cd   :  { %p152_p7 = pnand %p150_p6, %p147_p5 }
 0x2cf   :  { %155 = shalt.err (!%p152_p7)
}
 0x2d0   :  { %105 = dma.vmem_to_hbm [thread:$0]  %s103_s14, 16, %s198_s2, [#allocation3]  }
 0x2d1   :  { %156 = dma.done.wait [#allocation3], 16  }
 0x2d2   :  { %157 = vsyncadd [#allocation3], 4294967280 }
 0x2d3   :  { %109 = vsyncpa [#allocation3], 1 }

</bundles_post_ra>
